<compile_context>
chip_gen: v7x
topology: tpu7x:2x2x1
jax: 0.10.0
libtpu: 0.0.40
codegen_flags: <defaults>
</compile_context>

<pallas_src>
import functools

import jax
import jax.numpy as jnp
from jax.experimental import pallas as pl
from jax.experimental.pallas import tpu as pltpu


def _round_up(x, m):
    return ((x + m - 1) // m) * m


def _linear_kernel(x_ref, w_ref, b_ref, o_ref):
    # x: (tile_m, K)  w: (K, Nout_pad)  b: (1, Nout_pad)  o: (tile_m, Nout_pad)
    acc = jnp.dot(x_ref[...], w_ref[...], preferred_element_type=jnp.float32)
    o_ref[...] = (acc + b_ref[...]).astype(o_ref.dtype)


def _pick_tile_m(M, K, Nout, dtype_bytes=4,
                 vmem_budget=24 * 1024 * 1024, tile_m_max=8192):
    """Largest row tile (multiple of 8) whose double-buffered in+out footprint
    stays inside a VMEM budget that is safe on v5e/v6e/v7x scoped defaults."""
    k_pad = max(_round_up(K, 128), 128)      # channel dims are lane-padded in VMEM
    n_pad = max(_round_up(Nout, 128), 128)
    per_row = 2 * (k_pad + n_pad) * dtype_bytes   # x2 for double buffering
    tile_m = max(8, min(tile_m_max, (vmem_budget // per_row) // 8 * 8))
    return min(tile_m, _round_up(M, 8))


def pallas_linear(x2d, w_t, b_row):
    """y = x2d @ w_t + b_row (row-tiled, lane-dense output, f32)."""
    M, K = x2d.shape
    _, Nout = w_t.shape           # Nout is already padded to a multiple of 128
    tile_m = _pick_tile_m(M, K, Nout)
    grid = (pl.cdiv(M, tile_m),)
    return pl.pallas_call(
        _linear_kernel,
        out_shape=jax.ShapeDtypeStruct((M, Nout), jnp.float32),
        grid=grid,
        in_specs=[
            pl.BlockSpec((tile_m, K), lambda i: (i, 0)),   # row tile of activations
            pl.BlockSpec((K, Nout), lambda i: (0, 0)),     # weights resident
            pl.BlockSpec((1, Nout), lambda i: (0, 0)),     # bias resident
        ],
        out_specs=pl.BlockSpec((tile_m, Nout), lambda i: (i, 0)),
        compiler_params=pltpu.CompilerParams(
            # Row tiles are independent -> let v7x shard across its 2 TCs.
            dimension_semantics=("parallel",),
            vmem_limit_bytes=48 * 1024 * 1024,
        ),
    )(x2d, w_t, b_row)


class ProteinModelPallas:
    """JAX/Pallas port of ProteinModel's concrete forward-pass compute."""

    def __init__(self, s_in, p_in, node_dim_hidden, pair_dim_hidden,
                 project_in=True, key=jax.random.PRNGKey(0)):
        self.node_in, self.pair_in = s_in, p_in
        self.node_dim_hidden = node_dim_hidden
        self.pair_dim_hidden = pair_dim_hidden
        self.project_in = project_in
        if project_in:
            k1, k2, k3, k4 = jax.random.split(key, 4)
            lim_s = 1.0 / jnp.sqrt(s_in)
            lim_p = 1.0 / jnp.sqrt(p_in)
            # nn.Linear layout: weight (out, in), bias (out,)
            self.res_w = jax.random.uniform(k1, (node_dim_hidden, s_in),
                                            jnp.float32, -lim_s, lim_s)
            self.res_b = jax.random.uniform(k2, (node_dim_hidden,),
                                            jnp.float32, -lim_s, lim_s)
            self.pair_w = jax.random.uniform(k3, (pair_dim_hidden, p_in),
                                             jnp.float32, -lim_p, lim_p)
            self.pair_b = jax.random.uniform(k4, (pair_dim_hidden,),
                                             jnp.float32, -lim_p, lim_p)

            # Pre-transposed, lane-padded (>=128 output lanes) kernel params,
            # built once so forward() does no per-call .T / reshape.
            node_pad = max(_round_up(node_dim_hidden, 128), 128)
            pair_pad = max(_round_up(pair_dim_hidden, 128), 128)
            self._res_w_t = jnp.zeros((s_in, node_pad), jnp.float32
                                      ).at[:, :node_dim_hidden].set(self.res_w.T)
            self._res_b_row = jnp.zeros((1, node_pad), jnp.float32
                                        ).at[0, :node_dim_hidden].set(self.res_b)
            self._pair_w_t = jnp.zeros((p_in, pair_pad), jnp.float32
                                       ).at[:, :pair_dim_hidden].set(self.pair_w.T)
            self._pair_b_row = jnp.zeros((1, pair_pad), jnp.float32
                                         ).at[0, :pair_dim_hidden].set(self.pair_b)

        self._forward_jit = jax.jit(self._forward)

    def input_embedding(self, residue_in, pair_in):
        # TODO(synk): reference InputEmbedding is external; identity embedding.
        return residue_in, pair_in

    def _forward(self, residue_in, pair_in):
        residue_feats, pair_feats = self.input_embedding(residue_in, pair_in)
        if self.project_in:
            B, N, s_in = residue_feats.shape
            _, _, _, p_in = pair_feats.shape

            res2d = residue_feats.reshape(B * N, s_in)
            res_out = pallas_linear(res2d, self._res_w_t, self._res_b_row)
            residue_feats = res_out[:, :self.node_dim_hidden].reshape(B, N, -1)

            pair2d = pair_feats.reshape(B * N * N, p_in)
            pair_out = pallas_linear(pair2d, self._pair_w_t, self._pair_b_row)
            # forward() wraps projected pair feats in a 1-tuple
            pair_feats = (pair_out[:, :self.pair_dim_hidden].reshape(B, N, N, -1),)
        return residue_feats, pair_feats

    def forward(self, residue_in, pair_in):
        return self._forward_jit(residue_in, pair_in)


if __name__ == "__main__":
    key = jax.random.PRNGKey(0)
    k_res, k_pair, k_param = jax.random.split(key, 3)

    B, N = 2, 8
    s_in, p_in = 32, 16
    node_hidden, pair_hidden = 32, 32

    residue_in = jax.random.normal(k_res, (B, N, s_in), jnp.float32)
    pair_in = jax.random.normal(k_pair, (B, N, N, p_in), jnp.float32)

    model = ProteinModelPallas(s_in, p_in, node_hidden, pair_hidden,
                               project_in=True, key=k_param)

    res_out, (pair_out,) = model.forward(residue_in, pair_in)
    jax.block_until_ready(res_out)
    jax.block_until_ready(pair_out)

    # correctness check against plain-JAX reference
    res_ref = residue_in @ model.res_w.T + model.res_b
    pair_ref = pair_in @ model.pair_w.T + model.pair_b
    assert res_out.shape == (B, N, node_hidden)
    assert pair_out.shape == (B, N, N, pair_hidden)
    assert jnp.allclose(res_out, res_ref, atol=1e-5, rtol=1e-5)
    assert jnp.allclose(pair_out, pair_ref, atol=1e-5, rtol=1e-5)

    print("KERNEL_OK")
</pallas_src>

<mosaic_0001>
module attributes {stable_mosaic.version = 11 : i64} {
  func.func @_linear_kernel(%arg0: i32, %arg1: memref<128x16xf32, #tpu.memory_space<vmem>>, %arg2: memref<16x128xf32, #tpu.memory_space<vmem>>, %arg3: memref<1x128xf32, #tpu.memory_space<vmem>>, %arg4: memref<128x128xf32, #tpu.memory_space<vmem>>) attributes {dimension_semantics = [#tpu.dimension_semantics<parallel>], iteration_bounds = array<i64: 1>, scalar_prefetch = 0 : i64, scratch_operands = 0 : i64, tpu.core_type = #tpu.core_type<tc>, window_params = [{transform_indices = @transform_0, window_bounds = array<i64: 128, 16>}, {pipeline_mode = #tpu.pipeline_mode<synchronous>, transform_indices = @transform_1, window_bounds = array<i64: 16, 128>}, {pipeline_mode = #tpu.pipeline_mode<synchronous>, transform_indices = @transform_2, window_bounds = array<i64: 1, 128>}, {transform_indices = @transform_3, window_bounds = array<i64: 128, 128>}]} {
    %c0 = arith.constant 0 : index
    %c0_0 = arith.constant 0 : index
    %0 = vector.load %arg1[%c0, %c0_0] : memref<128x16xf32, #tpu.memory_space<vmem>>, vector<128x16xf32>
    %c0_1 = arith.constant 0 : index
    %c0_2 = arith.constant 0 : index
    %1 = vector.load %arg2[%c0_1, %c0_2] : memref<16x128xf32, #tpu.memory_space<vmem>>, vector<16x128xf32>
    %cst = arith.constant dense<0.000000e+00> : vector<128x128xf32>
    %2 = tpu.matmul %0, %1, %cst {dimension_numbers = #tpu.dot_dimension_numbers<[1], [0], [0], [1], [0, 0, 1, 1], [], []>} : vector<128x16xf32>, vector<16x128xf32>, vector<128x128xf32> -> vector<128x128xf32>
    %c0_3 = arith.constant 0 : index
    %c0_4 = arith.constant 0 : index
    %3 = vector.load %arg3[%c0_3, %c0_4] : memref<1x128xf32, #tpu.memory_space<vmem>>, vector<1x128xf32>
    %4 = vector.broadcast %3 : vector<1x128xf32> to vector<128x128xf32>
    %5 = arith.addf %2, %4 : vector<128x128xf32>
    %c0_5 = arith.constant 0 : index
    %c0_6 = arith.constant 0 : index
    %6 = vector.load %arg4[%c0_5, %c0_6] : memref<128x128xf32, #tpu.memory_space<vmem>>, vector<128x128xf32>
    tpu.vector_store %arg4[%c0_5, %c0_6], %5 {strides = array<i32>} : memref<128x128xf32, #tpu.memory_space<vmem>>, vector<128x128xf32>,
    return
  }
  func.func @transform_0(%arg0: i32) -> (i32, i32) {
    %c0_i32 = arith.constant 0 : i32
    %c0_i32_0 = arith.constant 0 : i32
    return %arg0, %c0_i32 : i32, i32
  }
  func.func @transform_1(%arg0: i32) -> (i32, i32) {
    %c0_i32 = arith.constant 0 : i32
    %c0_i32_0 = arith.constant 0 : i32
    %c0_i32_1 = arith.constant 0 : i32
    return %c0_i32, %c0_i32_0 : i32, i32
  }
  func.func @transform_2(%arg0: i32) -> (i32, i32) {
    %c0_i32 = arith.constant 0 : i32
    %c0_i32_0 = arith.constant 0 : i32
    %c0_i32_1 = arith.constant 0 : i32
    return %c0_i32, %c0_i32_0 : i32, i32
  }
  func.func @transform_3(%arg0: i32) -> (i32, i32) {
    %c0_i32 = arith.constant 0 : i32
    %c0_i32_0 = arith.constant 0 : i32
    return %arg0, %c0_i32 : i32, i32
  }
}

module attributes {stable_mosaic.version = 11 : i64} {
  func.func @_linear_kernel(%arg0: i32, %arg1: memref<16x32xf32, #tpu.memory_space<vmem>>, %arg2: memref<32x128xf32, #tpu.memory_space<vmem>>, %arg3: memref<1x128xf32, #tpu.memory_space<vmem>>, %arg4: memref<16x128xf32, #tpu.memory_space<vmem>>) attributes {dimension_semantics = [#tpu.dimension_semantics<parallel>], iteration_bounds = array<i64: 1>, scalar_prefetch = 0 : i64, scratch_operands = 0 : i64, tpu.core_type = #tpu.core_type<tc>, window_params = [{transform_indices = @transform_0, window_bounds = array<i64: 16, 32>}, {pipeline_mode = #tpu.pipeline_mode<synchronous>, transform_indices = @transform_1, window_bounds = array<i64: 32, 128>}, {pipeline_mode = #tpu.pipeline_mode<synchronous>, transform_indices = @transform_2, window_bounds = array<i64: 1, 128>}, {transform_indices = @transform_3, window_bounds = array<i64: 16, 128>}]} {
    %c0 = arith.constant 0 : index
    %c0_0 = arith.constant 0 : index
    %0 = vector.load %arg1[%c0, %c0_0] : memref<16x32xf32, #tpu.memory_space<vmem>>, vector<16x32xf32>
    %c0_1 = arith.constant 0 : index
    %c0_2 = arith.constant 0 : index
    %1 = vector.load %arg2[%c0_1, %c0_2] : memref<32x128xf32, #tpu.memory_space<vmem>>, vector<32x128xf32>
    %cst = arith.constant dense<0.000000e+00> : vector<16x128xf32>
    %2 = tpu.matmul %0, %1, %cst {dimension_numbers = #tpu.dot_dimension_numbers<[1], [0], [0], [1], [0, 0, 1, 1], [], []>} : vector<16x32xf32>, vector<32x128xf32>, vector<16x128xf32> -> vector<16x128xf32>
    %c0_3 = arith.constant 0 : index
    %c0_4 = arith.constant 0 : index
    %3 = vector.load %arg3[%c0_3, %c0_4] : memref<1x128xf32, #tpu.memory_space<vmem>>, vector<1x128xf32>
    %4 = vector.broadcast %3 : vector<1x128xf32> to vector<16x128xf32>
    %5 = arith.addf %2, %4 : vector<16x128xf32>
    %c0_5 = arith.constant 0 : index
    %c0_6 = arith.constant 0 : index
    %6 = vector.load %arg4[%c0_5, %c0_6] : memref<16x128xf32, #tpu.memory_space<vmem>>, vector<16x128xf32>
    tpu.vector_store %arg4[%c0_5, %c0_6], %5 {strides = array<i32>} : memref<16x128xf32, #tpu.memory_space<vmem>>, vector<16x128xf32>,
    return
  }
  func.func @transform_0(%arg0: i32) -> (i32, i32) {
    %c0_i32 = arith.constant 0 : i32
    %c0_i32_0 = arith.constant 0 : i32
    return %arg0, %c0_i32 : i32, i32
  }
  func.func @transform_1(%arg0: i32) -> (i32, i32) {
    %c0_i32 = arith.constant 0 : i32
    %c0_i32_0 = arith.constant 0 : i32
    %c0_i32_1 = arith.constant 0 : i32
    return %c0_i32, %c0_i32_0 : i32, i32
  }
  func.func @transform_2(%arg0: i32) -> (i32, i32) {
    %c0_i32 = arith.constant 0 : i32
    %c0_i32_0 = arith.constant 0 : i32
    %c0_i32_1 = arith.constant 0 : i32
    return %c0_i32, %c0_i32_0 : i32, i32
  }
  func.func @transform_3(%arg0: i32) -> (i32, i32) {
    %c0_i32 = arith.constant 0 : i32
    %c0_i32_0 = arith.constant 0 : i32
    return %arg0, %c0_i32 : i32, i32
  }
}

</mosaic_0001>

<bundles_post_ra>
// kernel: _forward.2
= control target key start
LH: loop header
LB: loop body
LE: loop exit
PB: predicated region body
PF: predicated region fallthrough
CT: control target
= control target key end

     0   :  { %8 = vsyncpa [#allocation3], 0  ;;  %s282_s0 = inlined_call_operand.hbm [shape: f32[16,32], index: 0, kind: input, shape index: {}]   ;;  %s283_s1 = inlined_call_operand.hbm [shape: f32[32,128], index: 1, kind: input, shape index: {}]   ;;  %s284_s2 = inlined_call_operand.vmem [shape: f32[1,128], index: 2, kind: input, shape index: {}]   ;;  %s285_s3 = inlined_call_operand.vmem [shape: f32[16,128], index: 3, kind: output, shape index: {}]  }
   0x1   :  { %9 = vsyncpa [#allocation5], 0  ;;  %s225_s12 = smov [#allocation2]   ;;  %s177_s16 = scalar_lea.hbm %s282_s0, 256 }
   0x2   :  { %s15_s13 = sshll.u32 %s225_s12, 4  ;;  %p178_p0 = scmp.ne.s32.totalorder %s282_s0, %s177_s16  ;;  %s16_s13 = int_to_ptr.vmem [resolvable:$true] %s15_s13 }
   0x3   :  { %p181_p1 = scmp.lt.u32.totalorder %s177_s16, %s282_s0 }
   0x5   :  { %p183_p2 = pnand %p181_p1, %p178_p0 }
   0x7   :  { %186 = shalt.err (!%p183_p2)
}
   0x8   :  { %s187_s21 = scalar_lea.vmem %s16_s13, 256  ;;  %p192_p4 = scmp.lt.s32.totalorder %s16_s13, %s16_s13 }
   0x9   :  { %p188_p3 = scmp.ne.s32.totalorder %s16_s13, %s187_s21  ;;  %p193_p5 = scmp.lt.s32.totalorder %s187_s21, %s187_s21 }
   0xb   :  { %p194_p6 = por %p193_p5, %p192_p4 }
   0xd   :  { %p195_p7 = pnand %p194_p6, %p188_p3 }
   0xf   :  { %198 = shalt.err (!%p195_p7)
}
  0x10   :  { %s226_s22 = smov 128   ;;  %s227_s23 = smov 8  }
  0x11   :  { %21 = dma.hbm_to_vmem [thread:$0]  %s282_s0, 256, %s16_s13, [#allocation3], %s226_s22, %s226_s22, %s227_s23  }
  0x12   :  { %s228_s26 = smov [#allocation4]   ;;  %s199_s30 = scalar_lea.hbm %s283_s1, 512 }
  0x13   :  { %s27_s27 = sshll.u32 %s228_s26, 4  ;;  %p200_p8 = scmp.ne.s32.totalorder %s283_s1, %s199_s30  ;;  %s28_s27 = int_to_ptr.vmem [resolvable:$true] %s27_s27 }
  0x14   :  { %p203_p9 = scmp.lt.u32.totalorder %s199_s30, %s283_s1 }
  0x16   :  { %p205_p10 = pnand %p203_p9, %p200_p8 }
  0x18   :  { %208 = shalt.err (!%p205_p10)
}
  0x19   :  { %s209_s8 = scalar_lea.vmem %s28_s27, 512  ;;  %p214_p12 = scmp.lt.s32.totalorder %s28_s27, %s28_s27 }
  0x1a   :  { %p210_p11 = scmp.ne.s32.totalorder %s28_s27, %s209_s8  ;;  %p215_p13 = scmp.lt.s32.totalorder %s209_s8, %s209_s8 }
  0x1c   :  { %p216_p0 = por %p215_p13, %p214_p12 }
  0x1e   :  { %p217_p1 = pnand %p216_p0, %p210_p11 }
  0x20   :  { %220 = shalt.err (!%p217_p1)
}
  0x21   :  { %33 = dma.hbm_to_vmem [thread:$0]  %s283_s1, 512, %s28_s27, [#allocation5], %s226_s22, %s226_s22, %s227_s23  }
  0x22   :  { %221 = dma.done.wait [#allocation3], 256  }
  0x23   :  { %222 = vsyncadd [#allocation3], 4294967040 }
  0x24   :  { %223 = dma.done.wait [#allocation5], 512  }
  0x25   :  { %224 = vsyncadd [#allocation5], 4294966784  ;;  %vm55_vm0 = vcmask 261120   ;;  %v44_v0 = vld [vmem:[#allocation4] sm:$0xff]  ;;  %v45_v1 = vld [vmem:[#allocation4 + $0x8] sm:$0xff] }
  0x26   :  { %v46_v2 = vld [vmem:[#allocation4 + $0x10] sm:$0xff]  ;;  %v165_v3 = vpack.c.bf16 %v45_v1, %v44_v0  ;;  %v47_v4 = vld [vmem:[#allocation4 + $0x18] sm:$0xff] }
  0x27   :  { %v42_v5 = vld [vmem:[#allocation2] sm:$0xff]  ;;  %v169_v6 = vpack.c.bf16 %v47_v4, %v46_v2  ;;  %v43_v7 = vld [vmem:[#allocation2 + $0x8] sm:$0xff] }
  0x28   :  { %162 = vmatprep.mubr.msk.f32.mxu0 %vm55_vm0, %v42_v5  ;;  %166 = vmatprep.subr.bf16.mxu0 %v165_v3  ;;  %v145_v8 = vld [vmem:[%s284_s2] ss:$0 sm:$0xff] }
  0x29   :  { %168 = vmatpush3.bf16.msra.mxu0 %v165_v3 }
  0x2a   :  { %170 = vmatprep.subr.bf16.mxu0 %v169_v6 }
  0x2d   :  { %172 = vmatpush3.bf16.msra.mxu0 %v169_v6 }
  0x30   :  { %163 = vmatmul.mubr.msk.f32.vlgmr.msra.gmra.mrb[0].mxu0 %vm55_vm0, %v43_v7 }
 0x103   :  { %v164_v9 = vpop.f32.mrb[0].mxu0 }
 0x104   :  { %v134_v10 = vadd.f32 %v164_v9, %v145_v8  ;;  %v128_v11 = vpop.f32.mrb[1].mxu0 }
 0x105   :  { %v129_v12 = vadd.f32 %v145_v8, %v128_v11 }
 0x106   :  { %138 = vst [vmem:[%s285_s3 + $0x8] sm:$0xff] %v134_v10 }
 0x107   :  { %137 = vst [vmem:[%s285_s3] sm:$0xff] %v129_v12 }
 0x108   :  { %143 = vsyncpa [#allocation3], 1 }
 0x109   :  { %144 = vsyncpa [#allocation5], 1 }

// kernel: _forward.3
= control target key start
LH: loop header
LB: loop body
LE: loop exit
PB: predicated region body
PF: predicated region fallthrough
CT: control target
= control target key end

     0   :  { %8 = vsyncpa [#allocation3], 0  ;;  %s481_s0 = inlined_call_operand.hbm [shape: f32[128,16], index: 0, kind: input, shape index: {}]   ;;  %s482_s1 = inlined_call_operand.vmem [shape: f32[16,128], index: 1, kind: input, shape index: {}]   ;;  %s483_s2 = inlined_call_operand.vmem [shape: f32[1,128], index: 2, kind: input, shape index: {}]   ;;  %s484_s3 = inlined_call_operand.hbm [shape: f32[128,128], index: 3, kind: output, shape index: {}]  }
   0x1   :  { %9 = vsyncpa [#allocation4], 0  ;;  %s402_s12 = smov [#allocation2]   ;;  %s354_s16 = scalar_lea.hbm %s481_s0, 2048 }
   0x2   :  { %s15_s13 = sshll.u32 %s402_s12, 4  ;;  %p355_p0 = scmp.ne.s32.totalorder %s481_s0, %s354_s16  ;;  %s16_s13 = int_to_ptr.vmem [resolvable:$true] %s15_s13 }
   0x3   :  { %p358_p1 = scmp.lt.u32.totalorder %s354_s16, %s481_s0 }
   0x5   :  { %p360_p2 = pnand %p358_p1, %p355_p0 }
   0x7   :  { %363 = shalt.err (!%p360_p2)
}
   0x8   :  { %s364_s21 = scalar_lea.vmem %s16_s13, 2048  ;;  %p369_p4 = scmp.lt.s32.totalorder %s16_s13, %s16_s13 }
   0x9   :  { %p365_p3 = scmp.ne.s32.totalorder %s16_s13, %s364_s21  ;;  %p370_p5 = scmp.lt.s32.totalorder %s364_s21, %s364_s21 }
   0xb   :  { %p371_p6 = por %p370_p5, %p369_p4 }
   0xd   :  { %p372_p7 = pnand %p371_p6, %p365_p3 }
   0xf   :  { %375 = shalt.err (!%p372_p7)
}
  0x10   :  { %s403_s22 = smov 128   ;;  %s404_s23 = smov 8  }
  0x11   :  { %21 = dma.hbm_to_vmem [thread:$0]  %s481_s0, 2048, %s16_s13, [#allocation3], %s403_s22, %s403_s22, %s404_s23  }
  0x12   :  { %398 = dma.done.wait [#allocation3], 2048  }
  0x13   :  { %399 = vsyncadd [#allocation3], 4294965248  ;;  %vm54_vm0 = vcmask 130048   ;;  %v45_v0 = vld [vmem:[%s482_s1] sm:$0xff]  ;;  %v46_v1 = vld [vmem:[%s482_s1 + $0x8] sm:$0xff] }
  0x14   :  { %v29_v2 = vld [vmem:[#allocation2] sm:$0xff]  ;;  %v344_v3 = vpack.c.bf16 %v46_v1, %v45_v0  ;;  %v30_v5 = vld [vmem:[#allocation2 + $0x8] sm:$0xff]  ;;  %v31_v7 = vld [vmem:[#allocation2 + $0x10] sm:$0xff] }
  0x15   :  { %320 = vmatprep.mubr.msk.f32.mxu0 %vm54_vm0, %v29_v2  ;;  %v37_v4 = vld [vmem:[#allocation2 + $0x40] sm:$0xff]  ;;  %v38_v6 = vld [vmem:[#allocation2 + $0x48] sm:$0xff]  ;;  %v39_v8 = vld [vmem:[#allocation2 + $0x50] sm:$0xff] }
  0x16   :  { %332 = vmatprep.mubr.msk.f32.mxu1 %vm54_vm0, %v37_v4  ;;  %345 = vmatprep.subr.bf16.mxu0 %v344_v3  ;;  %v32_v9 = vld [vmem:[#allocation2 + $0x18] sm:$0xff]  ;;  %v33_v11 = vld [vmem:[#allocation2 + $0x20] sm:$0xff]  ;;  %v34_v13 = vld [vmem:[#allocation2 + $0x28] sm:$0xff] }
  0x17   :  { %348 = vmatprep.subr.bf16.mxu1 %v344_v3  ;;  %347 = vmatpush3.bf16.msra.mxu0 %v344_v3  ;;  %v40_v10 = vld [vmem:[#allocation2 + $0x58] sm:$0xff]  ;;  %v41_v12 = vld [vmem:[#allocation2 + $0x60] sm:$0xff]  ;;  %v42_v14 = vld [vmem:[#allocation2 + $0x68] sm:$0xff] }
  0x18   :  { %349 = vmatpush3.bf16.msra.mxu1 %v344_v3  ;;  %v35_v15 = vld [vmem:[#allocation2 + $0x30] sm:$0xff]  ;;  %v36_v17 = vld [vmem:[#allocation2 + $0x38] sm:$0xff]  ;;  %v281_v19 = vld [vmem:[%s483_s2] ss:$0 sm:$0xff]  ;;  %s405_s2 = smov [#allocation5]  }
  0x19   :  { %v43_v16 = vld [vmem:[#allocation2 + $0x70] sm:$0xff]  ;;  %v44_v18 = vld [vmem:[#allocation2 + $0x78] sm:$0xff]  ;;  %s269_s30 = sshll.u32 %s405_s2, 4  ;;  %s270_s30 = int_to_ptr.vmem [resolvable:$true] %s269_s30 }
  0x1a   :  { %321 = vmatmul.mubr.msk.f32.vlgmr.msra.gmra.mrb[0].mxu0 %vm54_vm0, %v30_v5  ;;  %s376_s4 = scalar_lea.vmem %s270_s30, 2048  ;;  %p381_p9 = scmp.lt.s32.totalorder %s270_s30, %s270_s30 }
  0x1b   :  { %333 = vmatmul.mubr.msk.f32.vlgmr.msra.gmra.mrb[0].mxu1 %vm54_vm0, %v38_v6  ;;  %323 = vmatprep.mubr.msk.f32.mxu0 %vm54_vm0, %v31_v7  ;;  %p377_p8 = scmp.ne.s32.totalorder %s270_s30, %s376_s4  ;;  %p382_p10 = scmp.lt.s32.totalorder %s376_s4, %s376_s4 }
  0x1c   :  { %335 = vmatprep.mubr.msk.f32.mxu1 %vm54_vm0, %v39_v8 }
  0x1d   :  { %p383_p11 = por %p382_p10, %p381_p9 }
  0x1e   :  { %324 = vmatmul.mubr.msk.f32.gmra.mrb[2].mxu0 %vm54_vm0, %v32_v9 }
  0x1f   :  { %336 = vmatmul.mubr.msk.f32.gmra.mrb[2].mxu1 %vm54_vm0, %v40_v10  ;;  %326 = vmatprep.mubr.msk.f32.mxu0 %vm54_vm0, %v33_v11  ;;  %p384_p12 = pnand %p383_p11, %p377_p8 }
  0x20   :  { %338 = vmatprep.mubr.msk.f32.mxu1 %vm54_vm0, %v41_v12 }
  0x22   :  { %327 = vmatmul.mubr.msk.f32.gmra.mrb[4].mxu0 %vm54_vm0, %v34_v13 }
  0x23   :  { %339 = vmatmul.mubr.msk.f32.gmra.mrb[4].mxu1 %vm54_vm0, %v42_v14  ;;  %329 = vmatprep.mubr.msk.f32.mxu0 %vm54_vm0, %v35_v15 }
  0x24   :  { %341 = vmatprep.mubr.msk.f32.mxu1 %vm54_vm0, %v43_v16 }
  0x26   :  { %330 = vmatmul.mubr.msk.f32.gmra.mrb[6].mxu0 %vm54_vm0, %v36_v17 }
  0x27   :  { %342 = vmatmul.mubr.msk.f32.gmra.mrb[6].mxu1 %vm54_vm0, %v44_v18 }
  0xed   :  { %v322_v20 = vpop.f32.mrb[0].mxu0 }
  0xee   :  { %v334_v21 = vpop.f32.mrb[0].mxu1  ;;  %v175_v22 = vadd.f32 %v322_v20, %v281_v19  ;;  %v169_v24 = vpop.f32.mrb[1].mxu0 }
  0xef   :  { %v215_v23 = vadd.f32 %v334_v21, %v281_v19  ;;  %v209_v25 = vpop.f32.mrb[1].mxu1  ;;  %v170_v26 = vadd.f32 %v281_v19, %v169_v24 }
  0xf0   :  { %v210_v27 = vadd.f32 %v281_v19, %v209_v25  ;;  %249 = vst [vmem:[#allocation5 + $0x8] sm:$0xff] %v175_v22 }
  0xf1   :  { %257 = vst [vmem:[#allocation5 + $0x48] sm:$0xff] %v215_v23  ;;  %248 = vst [vmem:[#allocation5] sm:$0xff] %v170_v26  ;;  %v325_v28 = vpop.f32.mrb[2].mxu0 }
  0xf2   :  { %256 = vst [vmem:[#allocation5 + $0x40] sm:$0xff] %v210_v27  ;;  %v337_v29 = vpop.f32.mrb[2].mxu1  ;;  %v185_v30 = vadd.f32 %v325_v28, %v281_v19  ;;  %v179_v32 = vpop.f32.mrb[3].mxu0 }
  0xf3   :  { %v225_v31 = vadd.f32 %v337_v29, %v281_v19  ;;  %v219_v33 = vpop.f32.mrb[3].mxu1  ;;  %v180_v34 = vadd.f32 %v281_v19, %v179_v32 }
  0xf4   :  { %v220_v35 = vadd.f32 %v281_v19, %v219_v33  ;;  %251 = vst [vmem:[#allocation5 + $0x18] sm:$0xff] %v185_v30 }
  0xf5   :  { %259 = vst [vmem:[#allocation5 + $0x58] sm:$0xff] %v225_v31  ;;  %250 = vst [vmem:[#allocation5 + $0x10] sm:$0xff] %v180_v34  ;;  %v328_v36 = vpop.f32.mrb[4].mxu0 }
  0xf6   :  { %258 = vst [vmem:[#allocation5 + $0x50] sm:$0xff] %v220_v35  ;;  %v340_v37 = vpop.f32.mrb[4].mxu1  ;;  %v195_v38 = vadd.f32 %v328_v36, %v281_v19  ;;  %v189_v40 = vpop.f32.mrb[5].mxu0 }
  0xf7   :  { %v235_v39 = vadd.f32 %v340_v37, %v281_v19  ;;  %v229_v41 = vpop.f32.mrb[5].mxu1  ;;  %v190_v42 = vadd.f32 %v281_v19, %v189_v40 }
  0xf8   :  { %v230_v43 = vadd.f32 %v281_v19, %v229_v41  ;;  %253 = vst [vmem:[#allocation5 + $0x28] sm:$0xff] %v195_v38 }
  0xf9   :  { %261 = vst [vmem:[#allocation5 + $0x68] sm:$0xff] %v235_v39  ;;  %252 = vst [vmem:[#allocation5 + $0x20] sm:$0xff] %v190_v42  ;;  %v331_v44 = vpop.f32.mrb[6].mxu0 }
  0xfa   :  { %260 = vst [vmem:[#allocation5 + $0x60] sm:$0xff] %v230_v43  ;;  %v343_v45 = vpop.f32.mrb[6].mxu1  ;;  %v205_v46 = vadd.f32 %v331_v44, %v281_v19  ;;  %v199_v48 = vpop.f32.mrb[7].mxu0 }
  0xfb   :  { %v245_v47 = vadd.f32 %v343_v45, %v281_v19  ;;  %v239_v49 = vpop.f32.mrb[7].mxu1  ;;  %v200_v50 = vadd.f32 %v281_v19, %v199_v48 }
  0xfc   :  { %v240_v51 = vadd.f32 %v281_v19, %v239_v49  ;;  %255 = vst [vmem:[#allocation5 + $0x38] sm:$0xff] %v205_v46 }
  0xfd   :  { %263 = vst [vmem:[#allocation5 + $0x78] sm:$0xff] %v245_v47  ;;  %254 = vst [vmem:[#allocation5 + $0x30] sm:$0xff] %v200_v50 }
  0xfe   :  { %262 = vst [vmem:[#allocation5 + $0x70] sm:$0xff] %v240_v51 }
  0xff   :  { %387 = shalt.err (!%p384_p12)
}
 0x100   :  { %s388_s7 = scalar_lea.hbm %s484_s3, 2048 }
 0x101   :  { %p389_p13 = scmp.ne.s32.totalorder %s484_s3, %s388_s7  ;;  %p392_p0 = scmp.lt.u32.totalorder %s388_s7, %s484_s3 }
 0x103   :  { %p394_p1 = pnand %p392_p0, %p389_p13 }
 0x105   :  { %397 = shalt.err (!%p394_p1)
}
 0x106   :  { %275 = dma.vmem_to_hbm [thread:$0]  %s270_s30, 2048, %s484_s3, [#allocation4], %s403_s22, %s403_s22, %s404_s23  }
 0x107   :  { %400 = dma.done.wait [#allocation4], 2048  }
 0x108   :  { %401 = vsyncadd [#allocation4], 4294965248 }
 0x109   :  { %279 = vsyncpa [#allocation3], 1 }
 0x10a   :  { %280 = vsyncpa [#allocation4], 1 }

</bundles_post_ra>
